<compile_context>
chip_gen: v7x
topology: tpu7x:2x2x1
jax: 0.10.0
libtpu: 0.0.40
codegen_flags: <defaults>
</compile_context>

<pallas_src>
import math

import jax
import jax.numpy as jnp
from jax.experimental import pallas as pl
from jax.experimental.pallas import tpu as pltpu


def _resolve_view_size(in_shape, size):
    """Resolve a single -1 in `size` like torch.Tensor.view does."""
    total = math.prod(in_shape)
    size = tuple(int(s) for s in size)
    n_infer = sum(1 for s in size if s == -1)
    if n_infer > 1:
        raise ValueError("only one dimension can be inferred (-1) in view size")
    if n_infer == 1:
        known = math.prod(s for s in size if s != -1)
        if known == 0:
            raise ValueError("cannot infer -1 dimension when other dims multiply to 0")
        size = tuple(total // known if s == -1 else s for s in size)
    if math.prod(size) != total:
        raise ValueError(
            f"view size {size} is incompatible with input of {total} elements"
        )
    return size, total


def _make_dma_copy_kernel(chunks):
    """Build a kernel that DMA-copies `chunks` [(start, rows), ...] of the
    leading axis straight from the input HBM ref to the output HBM ref."""

    def kernel(x_hbm_ref, o_hbm_ref, sems):
        copies = []
        # Start every chunk's DMA before waiting on any, so multiple
        # descriptors are in flight at once.
        for i, (start, rows) in enumerate(chunks):
            cp = pltpu.make_async_copy(
                x_hbm_ref.at[pl.ds(start, rows)],
                o_hbm_ref.at[pl.ds(start, rows)],
                sems.at[i],
            )
            cp.start()
            copies.append(cp)
        for cp in copies:
            cp.wait()

    return kernel


def resize(x, size, *, copy=True, min_chunk_bytes=1 << 20, max_chunks=4):
    """Equivalent of torch.Tensor.view(size) for a contiguous tensor.

    copy=True  -> materialize the result through a Pallas HBM->HBM DMA copy.
    copy=False -> metadata-only jnp.reshape (fastest; no HBM round-trip).
    """
    size, total = _resolve_view_size(x.shape, size)

    # Degenerate cases (empty array, 0-d input) and the explicit
    # metadata-only fast path: no kernel at all.
    if not copy or total == 0 or x.ndim == 0:
        return jnp.reshape(x, size)

    itemsize = jnp.dtype(x.dtype).itemsize
    nbytes = total * itemsize
    lead = x.shape[0]

    # Up to `max_chunks` DMA descriptors along the leading axis, each at
    # least ~min_chunk_bytes, never more chunks than leading rows.
    n_chunks = int(max(1, min(max_chunks, lead, nbytes // max(1, min_chunk_bytes))))
    base = lead // n_chunks
    chunks = []
    start = 0
    for c in range(n_chunks):
        rows = base if c < n_chunks - 1 else lead - start
        chunks.append((start, rows))
        start += rows

    out = pl.pallas_call(
        _make_dma_copy_kernel(chunks),
        out_shape=jax.ShapeDtypeStruct(x.shape, x.dtype),
        in_specs=[pl.BlockSpec(memory_space=pl.ANY)],
        out_specs=pl.BlockSpec(memory_space=pl.ANY),
        scratch_shapes=[pltpu.SemaphoreType.DMA((n_chunks,))],
    )(x)

    # The view's target shape: metadata-only reshape on the copied buffer.
    return jnp.reshape(out, size)


if __name__ == "__main__":
    key = jax.random.PRNGKey(0)

    # 1) Resize(size=(2, 4, 256)) — same semantics as tensor.view(2, 4, 256).
    x = jax.random.normal(key, (2, 4, 16, 16), dtype=jnp.float32)
    target_size = (2, 4, 256)
    y = resize(x, target_size)
    jax.block_until_ready(y)
    ref = jnp.reshape(x, target_size)
    assert y.shape == target_size
    assert y.dtype == x.dtype
    assert bool(jnp.array_equal(y, ref))

    # 2) Element count NOT a multiple of 128 (ragged path, no padding now)
    #    and a -1 in the target size.
    x2 = jax.random.normal(jax.random.PRNGKey(1), (2, 3, 5, 7), dtype=jnp.float32)
    y2 = resize(x2, (6, -1))
    jax.block_until_ready(y2)
    ref2 = jnp.reshape(x2, (6, 35))
    assert y2.shape == (6, 35)
    assert bool(jnp.array_equal(y2, ref2))

    # 3) Multi-chunk DMA path (several descriptors in flight).
    x3 = jax.random.normal(jax.random.PRNGKey(2), (8, 4, 64, 64), dtype=jnp.float32)
    y3 = resize(x3, (8, -1), min_chunk_bytes=64 << 10)
    jax.block_until_ready(y3)
    ref3 = jnp.reshape(x3, (8, 4 * 64 * 64))
    assert y3.shape == (8, 4 * 64 * 64)
    assert bool(jnp.array_equal(y3, ref3))

    print("KERNEL_OK")
</pallas_src>

<mosaic_0001>
module attributes {stable_mosaic.version = 11 : i64} {
  func.func @kernel(%arg0: memref<2x4x16x16xf32, #tpu.memory_space<any>>, %arg1: memref<2x4x16x16xf32, #tpu.memory_space<any>>, %arg2: memref<1x!tpu.dma_semaphore, #tpu.memory_space<semaphore_mem>>) attributes {dimension_semantics = [], scalar_prefetch = 0 : i64, scratch_operands = 1 : i64, tpu.core_type = #tpu.core_type<tc>} {
    %c0_i32 = arith.constant 0 : i32
    %c0_i32_0 = arith.constant 0 : i32
    %c0_i32_1 = arith.constant 0 : i32
    %c0_i32_2 = arith.constant 0 : i32
    %c0_i32_3 = arith.constant 0 : i32
    %0 = tpu.memref_slice %arg0[%c0_i32_0, %c0_i32_1, %c0_i32_2, %c0_i32_3] : memref<2x4x16x16xf32, #tpu.memory_space<any>> -> memref<2x4x16x16xf32, #tpu.memory_space<any>>
    %c0_i32_4 = arith.constant 0 : i32
    %c0_i32_5 = arith.constant 0 : i32
    %c0_i32_6 = arith.constant 0 : i32
    %c0_i32_7 = arith.constant 0 : i32
    %1 = tpu.memref_slice %arg1[%c0_i32_4, %c0_i32_5, %c0_i32_6, %c0_i32_7] : memref<2x4x16x16xf32, #tpu.memory_space<any>> -> memref<2x4x16x16xf32, #tpu.memory_space<any>>
    %2 = tpu.memref_slice %arg2[%c0_i32] : memref<1x!tpu.dma_semaphore, #tpu.memory_space<semaphore_mem>> -> memref<1x!tpu.dma_semaphore, #tpu.memory_space<semaphore_mem>>
    %3 = tpu.memref_squeeze %2 : memref<1x!tpu.dma_semaphore, #tpu.memory_space<semaphore_mem>> -> memref<!tpu.dma_semaphore, #tpu.memory_space<semaphore_mem>>
    tpu.enqueue_dma source(%0 : memref<2x4x16x16xf32, #tpu.memory_space<any>>) target(%1 : memref<2x4x16x16xf32, #tpu.memory_space<any>>) target_semaphore(%3 : memref<!tpu.dma_semaphore, #tpu.memory_space<semaphore_mem>>)
    %c0_i32_8 = arith.constant 0 : i32
    %c0_i32_9 = arith.constant 0 : i32
    %c0_i32_10 = arith.constant 0 : i32
    %c0_i32_11 = arith.constant 0 : i32
    %c0_i32_12 = arith.constant 0 : i32
    %4 = tpu.memref_slice %arg0[%c0_i32_9, %c0_i32_10, %c0_i32_11, %c0_i32_12] : memref<2x4x16x16xf32, #tpu.memory_space<any>> -> memref<2x4x16x16xf32, #tpu.memory_space<any>>
    %c0_i32_13 = arith.constant 0 : i32
    %c0_i32_14 = arith.constant 0 : i32
    %c0_i32_15 = arith.constant 0 : i32
    %c0_i32_16 = arith.constant 0 : i32
    %5 = tpu.memref_slice %arg1[%c0_i32_13, %c0_i32_14, %c0_i32_15, %c0_i32_16] : memref<2x4x16x16xf32, #tpu.memory_space<any>> -> memref<2x4x16x16xf32, #tpu.memory_space<any>>
    %6 = tpu.memref_slice %arg2[%c0_i32_8] : memref<1x!tpu.dma_semaphore, #tpu.memory_space<semaphore_mem>> -> memref<1x!tpu.dma_semaphore, #tpu.memory_space<semaphore_mem>>
    %7 = tpu.memref_squeeze %6 : memref<1x!tpu.dma_semaphore, #tpu.memory_space<semaphore_mem>> -> memref<!tpu.dma_semaphore, #tpu.memory_space<semaphore_mem>>
    tpu.wait_dma2 semaphore(%7 : memref<!tpu.dma_semaphore, #tpu.memory_space<semaphore_mem>>) src(%4 : memref<2x4x16x16xf32, #tpu.memory_space<any>>) dst(%5 : memref<2x4x16x16xf32, #tpu.memory_space<any>>)
    return
  }
}

</mosaic_0001>

<bundles_post_ra>
// kernel: tpu_custom_call.1
= control target key start
LH: loop header
LB: loop body
LE: loop exit
PB: predicated region body
PF: predicated region fallthrough
CT: control target
= control target key end

     0   :  { %s36_s6 = smov [#allocation2]   ;;  %s37_s7 = smov [#allocation3]   ;;  %s55_s0 = inlined_call_operand.hbm [shape: f32[2,4,16,16], index: 0, kind: input, shape index: {}]   ;;  %s56_s1 = inlined_call_operand.hbm [shape: f32[2,4,16,16], index: 1, kind: output, shape index: {}]  }
   0x1   :  { %s38_s8 = smov 0  }
   0x2   :  { %18 = dma.general %s55_s0, 2048, %s56_s1, %s36_s6, %s37_s7, [#allocation4], %s38_s8, 0  }
   0x3   :  { %34 = dma.done.wait [#allocation2], 2048 }
   0x4   :  { %35 = vsyncadd [#allocation2], 4294965248 }
   0x5   :  { %24 = vsyncmov [#allocation2] }
   0x8   :  { %s25_s13 = vpop.sfrf %24 }
   0x9   :  { %p30_p0 = scmp.ne.s32.totalorder %s25_s13, 0 }
   0xb   :  { %29 = shalt.err (%p30_p0)  }

</bundles_post_ra>
